<compile_context>
chip_gen: v7x
topology: tpu7x:2x2x1
jax: 0.10.0
libtpu: 0.0.40
codegen_flags: <defaults>
</compile_context>

<pallas_src>
import jax
import jax.numpy as jnp
from jax.experimental import pallas as pl
from jax.experimental.pallas import tpu as pltpu

STATE_SIZE = 4
ACTION_SIZE = 2
FC1_UNITS = 64
FC2_UNITS = 64

OUT_PAD = 8            # fc3 columns padded 2 -> 8 (sublane-aligned, 32 B/row writeback)
TILE_B_MAX = 8192      # batch tile cap; sized for grid-step-overhead amortization, not VMEM
MIN_B_FOR_SPLIT = 2048 # only force a >=2-tile grid (v7x dual-TC) once there is enough work


def _round_up(n, m):
    return ((n + m - 1) // m) * m


def _cdiv(a, b):
    return (a + b - 1) // b


def _qnetwork_kernel(x_ref, w1_ref, b1_ref, w2_ref, b2_ref, w3_ref, b3_ref, o_ref):
    x = x_ref[...]                                                          # [tB, 4]
    # fc1: K=4 badly under-fills the MXU contraction depth, but the MXU slot is
    # otherwise idle here, so we leave it on the MXU (measure-first micro-opt).
    h1 = jnp.dot(x, w1_ref[...], preferred_element_type=jnp.float32)       # [tB, 64]
    h1 = jnp.maximum(h1 + b1_ref[...], 0.0)                                 # relu(fc1)
    h2 = jnp.dot(h1, w2_ref[...], preferred_element_type=jnp.float32)      # [tB, 64]
    h2 = jnp.maximum(h2 + b2_ref[...], 0.0)                                 # relu(fc2)
    out = jnp.dot(h2, w3_ref[...], preferred_element_type=jnp.float32)     # [tB, 8]
    o_ref[...] = (out + b3_ref[...]).astype(o_ref.dtype)                    # fc3


def qnetwork_forward(x, params):
    """x: [B, state_size] float32. params: dict of w1,b1,w2,b2,w3,b3."""
    w1, b1 = params["w1"], params["b1"]
    w2, b2 = params["w2"], params["b2"]
    w3, b3 = params["w3"], params["b3"]

    B = x.shape[0]

    # Tile selection: minimize padded rows, then (for v7x) make sure a large
    # batch produces at least 2 tiles so both TensorCores get work.
    n_tiles = _cdiv(_round_up(B, 8), TILE_B_MAX)
    if B >= MIN_B_FOR_SPLIT:
        n_tiles = max(2, n_tiles)
    tile_b = _round_up(_cdiv(B, n_tiles), 8)
    b_pad = n_tiles * tile_b
    if b_pad != B:
        x = jnp.pad(x, ((0, b_pad - B), (0, 0)))

    # fc3 columns padded 2 -> 8 with zeros (padded columns are exact zeros,
    # never stale VMEM) and sliced off before returning.
    w3p = jnp.pad(w3, ((0, 0), (0, OUT_PAD - ACTION_SIZE)))
    b3p = jnp.pad(b3, ((0, 0), (0, OUT_PAD - ACTION_SIZE)))

    # Batch-tiled activations; loop-invariant resident weights (constant
    # index_map => DMA'd once, kept VMEM-resident across batch tiles).
    x_spec = pl.BlockSpec((tile_b, STATE_SIZE), lambda i: (i, 0))
    resident = lambda shape: pl.BlockSpec(shape, lambda i: (0, 0))
    out_spec = pl.BlockSpec((tile_b, OUT_PAD), lambda i: (i, 0))

    weight_bytes = 4 * (
        STATE_SIZE * FC1_UNITS + FC1_UNITS
        + FC1_UNITS * FC2_UNITS + FC2_UNITS
        + FC2_UNITS * OUT_PAD + OUT_PAD
    )
    cost = pl.CostEstimate(
        flops=2 * b_pad * (STATE_SIZE * FC1_UNITS + FC1_UNITS * FC2_UNITS + FC2_UNITS * OUT_PAD),
        transcendentals=0,
        bytes_accessed=4 * b_pad * (STATE_SIZE + OUT_PAD) + weight_bytes,
    )

    out = pl.pallas_call(
        _qnetwork_kernel,
        out_shape=jax.ShapeDtypeStruct((b_pad, OUT_PAD), jnp.float32),
        grid=(n_tiles,),
        in_specs=[
            x_spec,
            resident((STATE_SIZE, FC1_UNITS)),
            resident((1, FC1_UNITS)),
            resident((FC1_UNITS, FC2_UNITS)),
            resident((1, FC2_UNITS)),
            resident((FC2_UNITS, OUT_PAD)),
            resident((1, OUT_PAD)),
        ],
        out_specs=out_spec,
        compiler_params=pltpu.CompilerParams(dimension_semantics=("parallel",)),
        cost_estimate=cost,
    )(x, w1, b1, w2, b2, w3p, b3p)

    # Drop batch padding and padded columns before any downstream argmax.
    return out[:B, :ACTION_SIZE]


def init_params(key):
    """Deterministic init mirroring nn.Linear's default U(-1/sqrt(fan_in), 1/sqrt(fan_in))."""
    def linear(key, fan_in, fan_out):
        kw, kb = jax.random.split(key)
        bound = 1.0 / jnp.sqrt(jnp.float32(fan_in))
        # stored as [in, out] so kernel computes x @ W
        w = jax.random.uniform(kw, (fan_in, fan_out), jnp.float32, -bound, bound)
        b = jax.random.uniform(kb, (1, fan_out), jnp.float32, -bound, bound)
        return w, b

    k1, k2, k3 = jax.random.split(key, 3)
    w1, b1 = linear(k1, STATE_SIZE, FC1_UNITS)
    w2, b2 = linear(k2, FC1_UNITS, FC2_UNITS)
    w3, b3 = linear(k3, FC2_UNITS, ACTION_SIZE)
    return {"w1": w1, "b1": b1, "w2": w2, "b2": b2, "w3": w3, "b3": b3}


if __name__ == "__main__":
    key = jax.random.PRNGKey(0)
    pkey, xkey = jax.random.split(key)
    params = init_params(pkey)

    # batch of 2 states: the example `state` from the spec plus one random state.
    state0 = jnp.array([[1.0, 0.0, 0.0, 0.0]], dtype=jnp.float32)
    state1 = jax.random.normal(xkey, (1, STATE_SIZE), jnp.float32)
    x = jnp.concatenate([state0, state1], axis=0)          # [2, 4]

    out = qnetwork_forward(x, params)
    jax.block_until_ready(out)

    # reference check in plain JAX
    ref = jnp.maximum(x @ params["w1"] + params["b1"], 0.0)
    ref = jnp.maximum(ref @ params["w2"] + params["b2"], 0.0)
    ref = ref @ params["w3"] + params["b3"]
    assert out.shape == (2, ACTION_SIZE)
    assert jnp.allclose(out, ref, atol=1e-5, rtol=1e-5)

    print("KERNEL_OK")
</pallas_src>

<mosaic_0001>
module attributes {stable_mosaic.version = 11 : i64} {
  func.func @_qnetwork_kernel(%arg0: i32, %arg1: memref<8x4xf32, #tpu.memory_space<vmem>>, %arg2: memref<4x64xf32, #tpu.memory_space<vmem>>, %arg3: memref<1x64xf32, #tpu.memory_space<vmem>>, %arg4: memref<64x64xf32, #tpu.memory_space<vmem>>, %arg5: memref<1x64xf32, #tpu.memory_space<vmem>>, %arg6: memref<64x8xf32, #tpu.memory_space<vmem>>, %arg7: memref<1x8xf32, #tpu.memory_space<vmem>>, %arg8: memref<8x8xf32, #tpu.memory_space<vmem>>) attributes {dimension_semantics = [#tpu.dimension_semantics<parallel>], iteration_bounds = array<i64: 1>, scalar_prefetch = 0 : i64, scratch_operands = 0 : i64, tpu.core_type = #tpu.core_type<tc>, window_params = [{transform_indices = @transform_0, window_bounds = array<i64: 8, 4>}, {pipeline_mode = #tpu.pipeline_mode<synchronous>, transform_indices = @transform_1, window_bounds = array<i64: 4, 64>}, {pipeline_mode = #tpu.pipeline_mode<synchronous>, transform_indices = @transform_2, window_bounds = array<i64: 1, 64>}, {pipeline_mode = #tpu.pipeline_mode<synchronous>, transform_indices = @transform_3, window_bounds = array<i64: 64, 64>}, {pipeline_mode = #tpu.pipeline_mode<synchronous>, transform_indices = @transform_4, window_bounds = array<i64: 1, 64>}, {pipeline_mode = #tpu.pipeline_mode<synchronous>, transform_indices = @transform_5, window_bounds = array<i64: 64, 8>}, {pipeline_mode = #tpu.pipeline_mode<synchronous>, transform_indices = @transform_6, window_bounds = array<i64: 1, 8>}, {transform_indices = @transform_7, window_bounds = array<i64: 8, 8>}]} {
    %c0 = arith.constant 0 : index
    %c0_0 = arith.constant 0 : index
    %0 = vector.load %arg1[%c0, %c0_0] : memref<8x4xf32, #tpu.memory_space<vmem>>, vector<8x4xf32>
    %c0_1 = arith.constant 0 : index
    %c0_2 = arith.constant 0 : index
    %1 = vector.load %arg2[%c0_1, %c0_2] : memref<4x64xf32, #tpu.memory_space<vmem>>, vector<4x64xf32>
    %cst = arith.constant dense<0.000000e+00> : vector<8x64xf32>
    %2 = tpu.matmul %0, %1, %cst {dimension_numbers = #tpu.dot_dimension_numbers<[1], [0], [0], [1], [0, 0, 1, 1], [], []>} : vector<8x4xf32>, vector<4x64xf32>, vector<8x64xf32> -> vector<8x64xf32>
    %c0_3 = arith.constant 0 : index
    %c0_4 = arith.constant 0 : index
    %3 = vector.load %arg3[%c0_3, %c0_4] : memref<1x64xf32, #tpu.memory_space<vmem>>, vector<1x64xf32>
    %4 = vector.broadcast %3 : vector<1x64xf32> to vector<8x64xf32>
    %5 = arith.addf %2, %4 : vector<8x64xf32>
    %cst_5 = arith.constant 0.000000e+00 : f32
    %6 = vector.broadcast %cst_5 : f32 to vector<8x64xf32>
    %7 = arith.maximumf %5, %6 : vector<8x64xf32>
    %c0_6 = arith.constant 0 : index
    %c0_7 = arith.constant 0 : index
    %8 = vector.load %arg4[%c0_6, %c0_7] : memref<64x64xf32, #tpu.memory_space<vmem>>, vector<64x64xf32>
    %cst_8 = arith.constant dense<0.000000e+00> : vector<8x64xf32>
    %9 = tpu.matmul %7, %8, %cst_8 {dimension_numbers = #tpu.dot_dimension_numbers<[1], [0], [0], [1], [0, 0, 1, 1], [], []>} : vector<8x64xf32>, vector<64x64xf32>, vector<8x64xf32> -> vector<8x64xf32>
    %c0_9 = arith.constant 0 : index
    %c0_10 = arith.constant 0 : index
    %10 = vector.load %arg5[%c0_9, %c0_10] : memref<1x64xf32, #tpu.memory_space<vmem>>, vector<1x64xf32>
    %11 = vector.broadcast %10 : vector<1x64xf32> to vector<8x64xf32>
    %12 = arith.addf %9, %11 : vector<8x64xf32>
    %cst_11 = arith.constant 0.000000e+00 : f32
    %13 = vector.broadcast %cst_11 : f32 to vector<8x64xf32>
    %14 = arith.maximumf %12, %13 : vector<8x64xf32>
    %c0_12 = arith.constant 0 : index
    %c0_13 = arith.constant 0 : index
    %15 = vector.load %arg6[%c0_12, %c0_13] : memref<64x8xf32, #tpu.memory_space<vmem>>, vector<64x8xf32>
    %cst_14 = arith.constant dense<0.000000e+00> : vector<8x8xf32>
    %16 = tpu.matmul %14, %15, %cst_14 {dimension_numbers = #tpu.dot_dimension_numbers<[1], [0], [0], [1], [0, 0, 1, 1], [], []>} : vector<8x64xf32>, vector<64x8xf32>, vector<8x8xf32> -> vector<8x8xf32>
    %c0_15 = arith.constant 0 : index
    %c0_16 = arith.constant 0 : index
    %17 = vector.load %arg7[%c0_15, %c0_16] : memref<1x8xf32, #tpu.memory_space<vmem>>, vector<1x8xf32>
    %18 = vector.broadcast %17 : vector<1x8xf32> to vector<8x8xf32>
    %19 = arith.addf %16, %18 : vector<8x8xf32>
    %c0_17 = arith.constant 0 : index
    %c0_18 = arith.constant 0 : index
    %20 = vector.load %arg8[%c0_17, %c0_18] : memref<8x8xf32, #tpu.memory_space<vmem>>, vector<8x8xf32>
    tpu.vector_store %arg8[%c0_17, %c0_18], %19 {strides = array<i32>} : memref<8x8xf32, #tpu.memory_space<vmem>>, vector<8x8xf32>,
    return
  }
  func.func @transform_0(%arg0: i32) -> (i32, i32) {
    %c0_i32 = arith.constant 0 : i32
    %c0_i32_0 = arith.constant 0 : i32
    return %arg0, %c0_i32 : i32, i32
  }
  func.func @transform_1(%arg0: i32) -> (i32, i32) {
    %c0_i32 = arith.constant 0 : i32
    %c0_i32_0 = arith.constant 0 : i32
    %c0_i32_1 = arith.constant 0 : i32
    return %c0_i32, %c0_i32_0 : i32, i32
  }
  func.func @transform_2(%arg0: i32) -> (i32, i32) {
    %c0_i32 = arith.constant 0 : i32
    %c0_i32_0 = arith.constant 0 : i32
    %c0_i32_1 = arith.constant 0 : i32
    return %c0_i32, %c0_i32_0 : i32, i32
  }
  func.func @transform_3(%arg0: i32) -> (i32, i32) {
    %c0_i32 = arith.constant 0 : i32
    %c0_i32_0 = arith.constant 0 : i32
    %c0_i32_1 = arith.constant 0 : i32
    return %c0_i32, %c0_i32_0 : i32, i32
  }
  func.func @transform_4(%arg0: i32) -> (i32, i32) {
    %c0_i32 = arith.constant 0 : i32
    %c0_i32_0 = arith.constant 0 : i32
    %c0_i32_1 = arith.constant 0 : i32
    return %c0_i32, %c0_i32_0 : i32, i32
  }
  func.func @transform_5(%arg0: i32) -> (i32, i32) {
    %c0_i32 = arith.constant 0 : i32
    %c0_i32_0 = arith.constant 0 : i32
    %c0_i32_1 = arith.constant 0 : i32
    return %c0_i32, %c0_i32_0 : i32, i32
  }
  func.func @transform_6(%arg0: i32) -> (i32, i32) {
    %c0_i32 = arith.constant 0 : i32
    %c0_i32_0 = arith.constant 0 : i32
    %c0_i32_1 = arith.constant 0 : i32
    return %c0_i32, %c0_i32_0 : i32, i32
  }
  func.func @transform_7(%arg0: i32) -> (i32, i32) {
    %c0_i32 = arith.constant 0 : i32
    %c0_i32_0 = arith.constant 0 : i32
    return %arg0, %c0_i32 : i32, i32
  }
}

</mosaic_0001>

<bundles_post_ra>
// kernel: tpu_custom_call.1
= control target key start
LH: loop header
LB: loop body
LE: loop exit
PB: predicated region body
PF: predicated region fallthrough
CT: control target
= control target key end

     0   :  { %vm40_vm0 = vcmask 1043456   ;;  %v431_v2 = vmov 0.0   ;;  %vm432_vm1 = vmmov 0   ;;  %vm36_vm2 = vcmask 31744   ;;  %s553_s0 = inlined_call_operand.vmem [shape: f32[8,4], index: 0, kind: input, shape index: {}]   ;;  %s554_s1 = inlined_call_operand.vmem [shape: f32[4,64], index: 1, kind: input, shape index: {}]   ;;  %s555_s2 = inlined_call_operand.vmem [shape: f32[1,64], index: 2, kind: input, shape index: {}]   ;;  %s556_s3 = inlined_call_operand.vmem [shape: f32[64,64], index: 3, kind: input, shape index: {}]   ;;  %s557_s4 = inlined_call_operand.vmem [shape: f32[1,64], index: 4, kind: input, shape index: {}]   ;;  %s558_s5 = inlined_call_operand.vmem [shape: f32[64,8], index: 5, kind: input, shape index: {}]   ;;  %s559_s6 = inlined_call_operand.vmem [shape: f32[1,8], index: 6, kind: input, shape index: {}]   ;;  %s560_s7 = inlined_call_operand.hbm [shape: f32[8,8], index: 7, kind: output, shape index: {}]  }
   0x1   :  { %v28_v0 = vld [vmem:[%s554_s1] sm:$0xf]  ;;  %336 = vmatprep.subr.mxu0 %v431_v2  ;;  %338 = vmatprep.mubr.msk.f32.mxu0 %vm432_vm1, %v431_v2  ;;  %v116_v4 = vld [vmem:[%s556_s3 + $0x8] sm:$0xff]  ;;  %v117_v5 = vld [vmem:[%s556_s3 + $0x10] sm:$0xff]  ;;  %v433_v6 = vmov 0.0|0.0  }
   0x2   :  { %v27_v1 = vld [vmem:[%s553_s0] sm:$0xff]  ;;  %337 = vmatpush3.msk.msra.mxu0 %vm40_vm0, %v28_v0  ;;  %379 = vmatprep.subr.bf16.mxu1 %v433_v6  ;;  %v118_v8 = vld [vmem:[%s556_s3 + $0x18] sm:$0xff] }
   0x3   :  { %v115_v3 = vld [vmem:[%s556_s3] sm:$0xff]  ;;  %339 = vmatmul.mubr.msk.f32.vlgmr.msra.gmra.mrb[0].mxu0 %vm36_vm2, %v27_v1  ;;  %357 = vmatprep.mubr.msk.f32.mxu1 %vm432_vm1, %v431_v2 }
   0x4   :  { %v380_v7 = vpack.c.bf16 %v116_v4, %v115_v3 }
   0x5   :  { %12 = vsyncpa [#allocation3], 0  ;;  %v383_v9 = vpack.c.bf16 %v118_v8, %v117_v5  ;;  %391 = vmatprep.subr.bf16.mxu0 %v433_v6  ;;  %v119_v10 = vld [vmem:[%s556_s3 + $0x20] sm:$0xff]  ;;  %v120_v11 = vld [vmem:[%s556_s3 + $0x28] sm:$0xff]  ;;  %376 = vmatprep.mubr.msk.f32.mxu0 %vm432_vm1, %v431_v2  ;;  %vm130_vm3 = vcmask 523264   ;;  %s434_s14 = smov [#allocation2]  }
   0x6   :  { %381 = vmatpush3.bf16.msra.mxu1 %v380_v7  ;;  %v386_v12 = vpack.c.bf16 %v120_v11, %v119_v10  ;;  %v121_v13 = vld [vmem:[%s556_s3 + $0x30] sm:$0xff]  ;;  %v122_v14 = vld [vmem:[%s556_s3 + $0x38] sm:$0xff]  ;;  %v205_v16 = vld [vmem:[%s558_s5] sm:$0xff]  ;;  %s301_s15 = sshll.u32 %s434_s14, 4  ;;  %vm293_vm4 = vcmask 64512   ;;  %s302_s15 = int_to_ptr.vmem [resolvable:$true] %s301_s15 }
   0x7   :  { %382 = vmatprep.subr.bf16.mxu1 %v433_v6  ;;  %v389_v15 = vpack.c.bf16 %v122_v14, %v121_v13  ;;  %v206_v17 = vld [vmem:[%s558_s5 + $0x8] sm:$0xff]  ;;  %v207_v18 = vld [vmem:[%s558_s5 + $0x10] sm:$0xff]  ;;  %v208_v20 = vld [vmem:[%s558_s5 + $0x18] sm:$0xff]  ;;  %p412_p1 = scmp.lt.s32.totalorder %s302_s15, %s302_s15 }
   0x8   :  { %v392_v19 = vpack.c.bf16 %v206_v17, %v205_v16  ;;  %v395_v21 = vpack.c.bf16 %v208_v20, %v207_v18  ;;  %v209_v22 = vld [vmem:[%s558_s5 + $0x20] sm:$0xff]  ;;  %v210_v23 = vld [vmem:[%s558_s5 + $0x28] sm:$0xff]  ;;  %v211_v30 = vld [vmem:[%s558_s5 + $0x30] sm:$0xff] }
   0x9   :  { %v398_v24 = vpack.c.bf16 %v210_v23, %v209_v22  ;;  %v309_v25 = vld [vmem:[%s555_s2] ss:$0 sm:$0xff]  ;;  %v212_v31 = vld [vmem:[%s558_s5 + $0x38] sm:$0xff]  ;;  %s407_s5 = scalar_lea.vmem %s302_s15, 128 }
   0xa   :  { %384 = vmatpush3.bf16.msra.mxu1 %v383_v9  ;;  %393 = vmatpush3.bf16.msra.mxu0 %v392_v19  ;;  %v401_v32 = vpack.c.bf16 %v212_v31, %v211_v30  ;;  %v312_v33 = vld [vmem:[%s557_s4] ss:$0 sm:$0xff]  ;;  %p408_p0 = scmp.ne.s32.totalorder %s302_s15, %s407_s5  ;;  %p413_p2 = scmp.lt.s32.totalorder %s407_s5, %s407_s5 }
   0xb   :  { %385 = vmatprep.subr.bf16.mxu1 %v433_v6  ;;  %394 = vmatprep.subr.bf16.mxu0 %v433_v6  ;;  %v314_v38 = vld [vmem:[%s559_s6] ss:$0 sm:$0xff] }
   0xc   :  { %p414_p3 = por %p413_p2, %p412_p1 }
   0xe   :  { %387 = vmatpush3.bf16.msra.mxu1 %v386_v12  ;;  %396 = vmatpush3.bf16.msra.mxu0 %v395_v21  ;;  %p415_p4 = pnand %p414_p3, %p408_p0 }
   0xf   :  { %388 = vmatprep.subr.bf16.mxu1 %v433_v6  ;;  %397 = vmatprep.subr.bf16.mxu0 %v433_v6 }
  0x12   :  { %390 = vmatpush3.bf16.msra.mxu1 %v389_v15  ;;  %399 = vmatpush3.bf16.msra.mxu0 %v398_v24 }
  0x13   :  { %400 = vmatprep.subr.bf16.mxu0 %v433_v6 }
  0x16   :  { %402 = vmatpush3.bf16.msra.mxu0 %v401_v32 }
  0xd6   :  { %v110_v26 = vpop.f32.mrb[0].mxu0 }
  0xd7   :  { %v111_v27 = vadd.f32 %v309_v25, %v110_v26  ;;  %v340_v28 = vpop.f32.mrb[1].mxu0 }
  0xd9   :  { %v114_v29 = vmax.f32 %v111_v27, 0.0 }
  0xdb   :  { %358 = vmatmul.mubr.msk.f32.vlgmr.msra.gmra.mrb[0].mxu1 %vm130_vm3, %v114_v29 }
 0x1ae   :  { %v200_v34 = vpop.f32.mrb[0].mxu1 }
 0x1af   :  { %v201_v35 = vadd.f32 %v312_v33, %v200_v34  ;;  %v359_v36 = vpop.f32.mrb[1].mxu1 }
 0x1b1   :  { %v204_v37 = vmax.f32 %v201_v35, 0.0 }
 0x1b3   :  { %377 = vmatmul.mubr.msk.f32.vlgmr.msra.gmra.mrb[2].mxu0 %vm130_vm3, %v204_v37 }
 0x286   :  { %v289_v39 = vpop.f32.mrb[2].mxu0 }
 0x287   :  { %v290_v40 = vadd.f32 %v314_v38, %v289_v39  ;;  %v378_v41 = vpop.f32.mrb[3].mxu0 }
 0x289   :  { %294 = vst.msk [vmem:[#allocation2] sm:$0xff] %vm293_vm4, %v290_v40 }
 0x28a   :  { %418 = shalt.err (!%p415_p4)
}
 0x28b   :  { %s419_s17 = scalar_lea.hbm %s560_s7, 128 }
 0x28c   :  { %p420_p5 = scmp.ne.s32.totalorder %s560_s7, %s419_s17  ;;  %p423_p6 = scmp.lt.u32.totalorder %s419_s17, %s560_s7 }
 0x28e   :  { %p425_p7 = pnand %p423_p6, %p420_p5 }
 0x290   :  { %428 = shalt.err (!%p425_p7)
}
 0x291   :  { %304 = dma.vmem_to_hbm [thread:$0]  %s302_s15, 128, %s560_s7, [#allocation3]  }
 0x292   :  { %429 = dma.done.wait [#allocation3], 128  }
 0x293   :  { %430 = vsyncadd [#allocation3], 4294967168 }
 0x294   :  { %308 = vsyncpa [#allocation3], 1 }

</bundles_post_ra>
